<compile_context>
chip_gen: v7x
topology: tpu7x:2x2x1
jax: 0.10.0
libtpu: 0.0.40
codegen_flags: <defaults>
</compile_context>

<pallas_src>
import functools

import jax
import jax.numpy as jnp
from jax.experimental import pallas as pl
from jax.experimental.pallas import tpu as pltpu


def pinn_kernel(xr_ref, xi_ref, w1r_ref, w1i_ref, b1_ref, w2_ref, b2_ref,
                w3_ref, b3_ref, out_ref):
    md = w2_ref.dtype  # matmul input dtype (bf16 or f32); accumulation is f32.

    # Layer 1: x @ W1 + b1 done as xr @ W1[:N] + xi @ W1[N:] (fused concat).
    acc = jnp.dot(xr_ref[...], w1r_ref[...], preferred_element_type=jnp.float32)
    acc = acc + jnp.dot(xi_ref[...], w1i_ref[...],
                        preferred_element_type=jnp.float32)
    h1 = jnp.tanh(acc + b1_ref[...])                              # (TB, H) f32

    # Layer 2.
    h2 = jnp.tanh(
        jnp.dot(h1.astype(md), w2_ref[...],
                preferred_element_type=jnp.float32) + b2_ref[...]
    )                                                             # (TB, H) f32

    # Layer 3 (output columns zero-padded to a lane-dense 128-multiple).
    out_ref[...] = (
        jnp.dot(h2.astype(md), w3_ref[...],
                preferred_element_type=jnp.float32) + b3_ref[...]
    )                                                             # (TB, OUT_PAD)


@functools.partial(jax.jit, static_argnames=("matmul_dtype", "batch_tile"))
def flexible_pinn_forward(S, params, matmul_dtype=jnp.bfloat16, batch_tile=512):
    """S: complex64 array of shape (B, num_buses). Returns (V_mag, V_ang)."""
    B, num_buses = S.shape
    w1, b1, w2, b2, w3, b3 = params
    hidden = w1.shape[1]
    out_dim = w3.shape[1]                         # = 2 * num_buses
    out_pad = pl.cdiv(out_dim, 128) * 128         # lane-dense output width

    md = matmul_dtype
    itemsize = jnp.finfo(md).bits // 8

    # Split real/imag inside the same jit (no materialized concat in HBM).
    xr = jnp.real(S).astype(jnp.float32)
    xi = jnp.imag(S).astype(jnp.float32)

    # Batch tile: multiple of 8 sublanes, capped at batch_tile; pad B up.
    tb = min(batch_tile, ((B + 7) // 8) * 8)
    b_pad = pl.cdiv(B, tb) * tb
    if b_pad != B:
        xr = jnp.pad(xr, ((0, b_pad - B), (0, 0)))
        xi = jnp.pad(xi, ((0, b_pad - B), (0, 0)))
    xr_m = xr.astype(md)
    xi_m = xi.astype(md)

    # Weights in matmul dtype; biases stay f32; W3/b3 zero-padded to out_pad.
    w1r = w1[:num_buses].astype(md)
    w1i = w1[num_buses:].astype(md)
    w2_m = w2.astype(md)
    w3_m = jnp.pad(w3, ((0, 0), (0, out_pad - out_dim))).astype(md)
    b1_f = b1.reshape(1, hidden).astype(jnp.float32)
    b2_f = b2.reshape(1, hidden).astype(jnp.float32)
    b3_f = jnp.pad(b3.reshape(1, out_dim).astype(jnp.float32),
                   ((0, 0), (0, out_pad - out_dim)))

    grid = (b_pad // tb,)

    flops = 2 * b_pad * (2 * num_buses * hidden + hidden * hidden
                         + hidden * out_pad)
    transcendentals = 2 * b_pad * hidden
    bytes_accessed = (
        2 * b_pad * num_buses * itemsize                       # xr, xi
        + b_pad * out_pad * 4                                  # output
        + (2 * num_buses * hidden + hidden * hidden
           + hidden * out_pad) * itemsize                      # weights
        + (2 * hidden + out_pad) * 4                           # biases
    )

    out = pl.pallas_call(
        pinn_kernel,
        out_shape=jax.ShapeDtypeStruct((b_pad, out_pad), jnp.float32),
        grid=grid,
        in_specs=[
            pl.BlockSpec((tb, num_buses), lambda i: (i, 0)),        # xr
            pl.BlockSpec((tb, num_buses), lambda i: (i, 0)),        # xi
            pl.BlockSpec((num_buses, hidden), lambda i: (0, 0)),    # w1r (resident)
            pl.BlockSpec((num_buses, hidden), lambda i: (0, 0)),    # w1i (resident)
            pl.BlockSpec((1, hidden), lambda i: (0, 0)),            # b1  (resident)
            pl.BlockSpec((hidden, hidden), lambda i: (0, 0)),       # w2  (resident)
            pl.BlockSpec((1, hidden), lambda i: (0, 0)),            # b2  (resident)
            pl.BlockSpec((hidden, out_pad), lambda i: (0, 0)),      # w3  (resident)
            pl.BlockSpec((1, out_pad), lambda i: (0, 0)),           # b3  (resident)
        ],
        out_specs=pl.BlockSpec((tb, out_pad), lambda i: (i, 0)),
        compiler_params=pltpu.CompilerParams(
            dimension_semantics=("parallel",)),
        cost_estimate=pl.CostEstimate(
            flops=flops,
            transcendentals=transcendentals,
            bytes_accessed=bytes_accessed),
    )(xr_m, xi_m, w1r, w1i, b1_f, w2_m, b2_f, w3_m, b3_f)

    out = out[:B, :out_dim]
    V_mag = out[:, :num_buses]
    V_ang = out[:, num_buses:]
    return V_mag, V_ang


def init_params(key, num_buses, hidden=256):
    """Deterministic PyTorch-style (uniform +/- 1/sqrt(fan_in)) init."""
    in_dim = 2 * num_buses
    dims = [(in_dim, hidden), (hidden, hidden), (hidden, in_dim)]
    params = []
    for (fan_in, fan_out) in dims:
        key, kw, kb = jax.random.split(key, 3)
        bound = 1.0 / jnp.sqrt(fan_in)
        w = jax.random.uniform(kw, (fan_in, fan_out), jnp.float32, -bound, bound)
        b = jax.random.uniform(kb, (1, fan_out), jnp.float32, -bound, bound)
        params += [w, b]
    return tuple(params)


def reference_forward(S, params, num_buses, matmul_dtype=jnp.float32):
    """Pure-JAX reference of the PyTorch forward (same precision policy)."""
    x = jnp.concatenate([jnp.real(S), jnp.imag(S)], axis=1).astype(jnp.float32)
    w1, b1, w2, b2, w3, b3 = params
    md = matmul_dtype
    h1 = jnp.tanh(jnp.dot(x.astype(md), w1.astype(md),
                          preferred_element_type=jnp.float32) + b1)
    h2 = jnp.tanh(jnp.dot(h1.astype(md), w2.astype(md),
                          preferred_element_type=jnp.float32) + b2)
    out = jnp.dot(h2.astype(md), w3.astype(md),
                  preferred_element_type=jnp.float32) + b3
    return out[:, :num_buses], out[:, num_buses:]


if __name__ == "__main__":
    num_buses = 8
    batch = 8

    key = jax.random.PRNGKey(0)
    k_params, k_re, k_im = jax.random.split(key, 3)

    params = init_params(k_params, num_buses)

    S_real = jax.random.normal(k_re, (batch, num_buses), jnp.float32)
    S_imag = jax.random.normal(k_im, (batch, num_buses), jnp.float32)
    S = (S_real + 1j * S_imag).astype(jnp.complex64)

    # Exact f32 path (v5e-style): must match the f32 reference tightly.
    V_mag32, V_ang32 = flexible_pinn_forward(S, params,
                                             matmul_dtype=jnp.float32)
    V_mag32 = jax.block_until_ready(V_mag32)
    V_ang32 = jax.block_until_ready(V_ang32)
    ref_mag, ref_ang = reference_forward(S, params, num_buses, jnp.float32)
    assert V_mag32.shape == (batch, num_buses)
    assert V_ang32.shape == (batch, num_buses)
    assert jnp.allclose(V_mag32, ref_mag, atol=1e-5, rtol=1e-5)
    assert jnp.allclose(V_ang32, ref_ang, atol=1e-5, rtol=1e-5)

    # Default bf16-MXU fast path (v6e/v7x): compare against a matched-precision
    # pure-JAX reference.
    V_mag, V_ang = flexible_pinn_forward(S, params)
    V_mag = jax.block_until_ready(V_mag)
    V_ang = jax.block_until_ready(V_ang)
    ref_mag_bf, ref_ang_bf = reference_forward(S, params, num_buses,
                                               jnp.bfloat16)
    assert V_mag.shape == (batch, num_buses)
    assert V_ang.shape == (batch, num_buses)
    assert jnp.allclose(V_mag, ref_mag_bf, atol=1e-3, rtol=1e-3)
    assert jnp.allclose(V_ang, ref_ang_bf, atol=1e-3, rtol=1e-3)

    print("KERNEL_OK")
</pallas_src>

<mosaic_0001>
module attributes {stable_mosaic.version = 11 : i64} {
  func.func @pinn_kernel(%arg0: i32, %arg1: memref<8x8xf32, #tpu.memory_space<vmem>>, %arg2: memref<8x8xf32, #tpu.memory_space<vmem>>, %arg3: memref<8x256xf32, #tpu.memory_space<vmem>>, %arg4: memref<8x256xf32, #tpu.memory_space<vmem>>, %arg5: memref<1x256xf32, #tpu.memory_space<vmem>>, %arg6: memref<256x256xf32, #tpu.memory_space<vmem>>, %arg7: memref<1x256xf32, #tpu.memory_space<vmem>>, %arg8: memref<256x128xf32, #tpu.memory_space<vmem>>, %arg9: memref<1x128xf32, #tpu.memory_space<vmem>>, %arg10: memref<8x128xf32, #tpu.memory_space<vmem>>) attributes {dimension_semantics = [#tpu.dimension_semantics<parallel>], iteration_bounds = array<i64: 1>, scalar_prefetch = 0 : i64, scratch_operands = 0 : i64, tpu.core_type = #tpu.core_type<tc>, window_params = [{transform_indices = @transform_0, window_bounds = array<i64: 8, 8>}, {transform_indices = @transform_1, window_bounds = array<i64: 8, 8>}, {pipeline_mode = #tpu.pipeline_mode<synchronous>, transform_indices = @transform_2, window_bounds = array<i64: 8, 256>}, {pipeline_mode = #tpu.pipeline_mode<synchronous>, transform_indices = @transform_3, window_bounds = array<i64: 8, 256>}, {pipeline_mode = #tpu.pipeline_mode<synchronous>, transform_indices = @transform_4, window_bounds = array<i64: 1, 256>}, {pipeline_mode = #tpu.pipeline_mode<synchronous>, transform_indices = @transform_5, window_bounds = array<i64: 256, 256>}, {pipeline_mode = #tpu.pipeline_mode<synchronous>, transform_indices = @transform_6, window_bounds = array<i64: 1, 256>}, {pipeline_mode = #tpu.pipeline_mode<synchronous>, transform_indices = @transform_7, window_bounds = array<i64: 256, 128>}, {pipeline_mode = #tpu.pipeline_mode<synchronous>, transform_indices = @transform_8, window_bounds = array<i64: 1, 128>}, {transform_indices = @transform_9, window_bounds = array<i64: 8, 128>}]} {
    %c0 = arith.constant 0 : index
    %c0_0 = arith.constant 0 : index
    %0 = vector.load %arg1[%c0, %c0_0] : memref<8x8xf32, #tpu.memory_space<vmem>>, vector<8x8xf32>
    %c0_1 = arith.constant 0 : index
    %c0_2 = arith.constant 0 : index
    %1 = vector.load %arg3[%c0_1, %c0_2] : memref<8x256xf32, #tpu.memory_space<vmem>>, vector<8x256xf32>
    %cst = arith.constant dense<0.000000e+00> : vector<8x256xf32>
    %2 = tpu.matmul %0, %1, %cst {dimension_numbers = #tpu.dot_dimension_numbers<[1], [0], [0], [1], [0, 0, 1, 1], [], []>} : vector<8x8xf32>, vector<8x256xf32>, vector<8x256xf32> -> vector<8x256xf32>
    %c0_3 = arith.constant 0 : index
    %c0_4 = arith.constant 0 : index
    %3 = vector.load %arg2[%c0_3, %c0_4] : memref<8x8xf32, #tpu.memory_space<vmem>>, vector<8x8xf32>
    %c0_5 = arith.constant 0 : index
    %c0_6 = arith.constant 0 : index
    %4 = vector.load %arg4[%c0_5, %c0_6] : memref<8x256xf32, #tpu.memory_space<vmem>>, vector<8x256xf32>
    %cst_7 = arith.constant dense<0.000000e+00> : vector<8x256xf32>
    %5 = tpu.matmul %3, %4, %cst_7 {dimension_numbers = #tpu.dot_dimension_numbers<[1], [0], [0], [1], [0, 0, 1, 1], [], []>} : vector<8x8xf32>, vector<8x256xf32>, vector<8x256xf32> -> vector<8x256xf32>
    %6 = arith.addf %2, %5 : vector<8x256xf32>
    %c0_8 = arith.constant 0 : index
    %c0_9 = arith.constant 0 : index
    %7 = vector.load %arg5[%c0_8, %c0_9] : memref<1x256xf32, #tpu.memory_space<vmem>>, vector<1x256xf32>
    %8 = vector.broadcast %7 : vector<1x256xf32> to vector<8x256xf32>
    %9 = arith.addf %6, %8 : vector<8x256xf32>
    %10 = math.tanh %9 : vector<8x256xf32>
    %c0_10 = arith.constant 0 : index
    %c0_11 = arith.constant 0 : index
    %11 = vector.load %arg6[%c0_10, %c0_11] : memref<256x256xf32, #tpu.memory_space<vmem>>, vector<256x256xf32>
    %cst_12 = arith.constant dense<0.000000e+00> : vector<8x256xf32>
    %12 = tpu.matmul %10, %11, %cst_12 {dimension_numbers = #tpu.dot_dimension_numbers<[1], [0], [0], [1], [0, 0, 1, 1], [], []>} : vector<8x256xf32>, vector<256x256xf32>, vector<8x256xf32> -> vector<8x256xf32>
    %c0_13 = arith.constant 0 : index
    %c0_14 = arith.constant 0 : index
    %13 = vector.load %arg7[%c0_13, %c0_14] : memref<1x256xf32, #tpu.memory_space<vmem>>, vector<1x256xf32>
    %14 = vector.broadcast %13 : vector<1x256xf32> to vector<8x256xf32>
    %15 = arith.addf %12, %14 : vector<8x256xf32>
    %16 = math.tanh %15 : vector<8x256xf32>
    %c0_15 = arith.constant 0 : index
    %c0_16 = arith.constant 0 : index
    %17 = vector.load %arg8[%c0_15, %c0_16] : memref<256x128xf32, #tpu.memory_space<vmem>>, vector<256x128xf32>
    %cst_17 = arith.constant dense<0.000000e+00> : vector<8x128xf32>
    %18 = tpu.matmul %16, %17, %cst_17 {dimension_numbers = #tpu.dot_dimension_numbers<[1], [0], [0], [1], [0, 0, 1, 1], [], []>} : vector<8x256xf32>, vector<256x128xf32>, vector<8x128xf32> -> vector<8x128xf32>
    %c0_18 = arith.constant 0 : index
    %c0_19 = arith.constant 0 : index
    %19 = vector.load %arg9[%c0_18, %c0_19] : memref<1x128xf32, #tpu.memory_space<vmem>>, vector<1x128xf32>
    %20 = vector.broadcast %19 : vector<1x128xf32> to vector<8x128xf32>
    %21 = arith.addf %18, %20 : vector<8x128xf32>
    %c0_20 = arith.constant 0 : index
    %c0_21 = arith.constant 0 : index
    %22 = vector.load %arg10[%c0_20, %c0_21] : memref<8x128xf32, #tpu.memory_space<vmem>>, vector<8x128xf32>
    tpu.vector_store %arg10[%c0_20, %c0_21], %21 {strides = array<i32>} : memref<8x128xf32, #tpu.memory_space<vmem>>, vector<8x128xf32>,
    return
  }
  func.func @transform_0(%arg0: i32) -> (i32, i32) {
    %c0_i32 = arith.constant 0 : i32
    %c0_i32_0 = arith.constant 0 : i32
    return %arg0, %c0_i32 : i32, i32
  }
  func.func @transform_1(%arg0: i32) -> (i32, i32) {
    %c0_i32 = arith.constant 0 : i32
    %c0_i32_0 = arith.constant 0 : i32
    return %arg0, %c0_i32 : i32, i32
  }
  func.func @transform_2(%arg0: i32) -> (i32, i32) {
    %c0_i32 = arith.constant 0 : i32
    %c0_i32_0 = arith.constant 0 : i32
    %c0_i32_1 = arith.constant 0 : i32
    return %c0_i32, %c0_i32_0 : i32, i32
  }
  func.func @transform_3(%arg0: i32) -> (i32, i32) {
    %c0_i32 = arith.constant 0 : i32
    %c0_i32_0 = arith.constant 0 : i32
    %c0_i32_1 = arith.constant 0 : i32
    return %c0_i32, %c0_i32_0 : i32, i32
  }
  func.func @transform_4(%arg0: i32) -> (i32, i32) {
    %c0_i32 = arith.constant 0 : i32
    %c0_i32_0 = arith.constant 0 : i32
    %c0_i32_1 = arith.constant 0 : i32
    return %c0_i32, %c0_i32_0 : i32, i32
  }
  func.func @transform_5(%arg0: i32) -> (i32, i32) {
    %c0_i32 = arith.constant 0 : i32
    %c0_i32_0 = arith.constant 0 : i32
    %c0_i32_1 = arith.constant 0 : i32
    return %c0_i32, %c0_i32_0 : i32, i32
  }
  func.func @transform_6(%arg0: i32) -> (i32, i32) {
    %c0_i32 = arith.constant 0 : i32
    %c0_i32_0 = arith.constant 0 : i32
    %c0_i32_1 = arith.constant 0 : i32
    return %c0_i32, %c0_i32_0 : i32, i32
  }
  func.func @transform_7(%arg0: i32) -> (i32, i32) {
    %c0_i32 = arith.constant 0 : i32
    %c0_i32_0 = arith.constant 0 : i32
    %c0_i32_1 = arith.constant 0 : i32
    return %c0_i32, %c0_i32_0 : i32, i32
  }
  func.func @transform_8(%arg0: i32) -> (i32, i32) {
    %c0_i32 = arith.constant 0 : i32
    %c0_i32_0 = arith.constant 0 : i32
    %c0_i32_1 = arith.constant 0 : i32
    return %c0_i32, %c0_i32_0 : i32, i32
  }
  func.func @transform_9(%arg0: i32) -> (i32, i32) {
    %c0_i32 = arith.constant 0 : i32
    %c0_i32_0 = arith.constant 0 : i32
    return %arg0, %c0_i32 : i32, i32
  }
}

</mosaic_0001>

<bundles_post_ra>
// kernel: custom-call
= control target key start
LH: loop header
LB: loop body
LE: loop exit
PB: predicated region body
PF: predicated region fallthrough
CT: control target
= control target key end

     0   :  { %2 = vsyncpa [#allocation0], 0  ;;  %s61_s0 = inlined_call_operand.hbm [shape: c64[8,8], index: 0, kind: input, shape index: {}]   ;;  %s62_s1 = inlined_call_operand.vmem [shape: f32[8,8], index: 1, kind: output, shape index: {}]  }
   0x1   :  { %s3_s8 = sshll.u32 %s62_s1, 4  ;;  %s9_s11 = scalar_lea.hbm %s61_s0, 128  ;;  %s4_s8 = int_to_ptr.vmem [resolvable:$true] %s3_s8 }
   0x2   :  { %p10_p0 = scmp.ne.s32.totalorder %s61_s0, %s9_s11  ;;  %s11_s16 = scalar_lea.hbm %s61_s0, 256 }
   0x3   :  { %p12_p1 = scmp.lt.u32.totalorder %s11_s16, %s9_s11  ;;  %p13_p2 = scmp.lt.u32.totalorder %s9_s11, %s61_s0 }
   0x5   :  { %p14_p3 = por %p13_p2, %p12_p1 }
   0x7   :  { %p15_p4 = pnand %p14_p3, %p10_p0 }
   0x9   :  { %18 = shalt.err (!%p15_p4)  }
   0xa   :  { %s19_s1 = scalar_lea.vmem %s4_s8, 128  ;;  %p24_p6 = scmp.lt.s32.totalorder %s4_s8, %s4_s8 }
   0xb   :  { %p20_p5 = scmp.ne.s32.totalorder %s4_s8, %s19_s1  ;;  %p25_p7 = scmp.lt.s32.totalorder %s19_s1, %s19_s1 }
   0xd   :  { %p26_p8 = por %p25_p7, %p24_p6 }
   0xf   :  { %p27_p9 = pnand %p26_p8, %p20_p5 }
  0x11   :  { %30 = shalt.err (!%p27_p9)  }
  0x12   :  { %6 = dma.hbm_to_vmem [thread:$0]  %s61_s0, 128, %s4_s8, [#allocation0] }
  0x13   :  { %31 = dma.done.wait [#allocation0], 128  }
  0x14   :  { %32 = vsyncadd [#allocation0], 4294967168 }
  0x15   :  { %8 = vsyncpa [#allocation0], 1 }

// kernel: custom-call.1
= control target key start
LH: loop header
LB: loop body
LE: loop exit
PB: predicated region body
PF: predicated region fallthrough
CT: control target
= control target key end

     0   :  { %s59_s0 = inlined_call_operand.hbm [shape: c64[8,8], index: 0, kind: input, shape index: {}]   ;;  %s60_s1 = inlined_call_operand.vmem [shape: f32[8,8], index: 1, kind: output, shape index: {}]  }
   0x1   :  { %s2_s8 = scalar_lea.hbm %s59_s0, 128 }
   0x2   :  { %3 = vsyncpa [#allocation0], 0  ;;  %s4_s11 = sshll.u32 %s60_s1, 4  ;;  %s34_s14 = scalar_lea.hbm %s59_s0, 256  ;;  %s5_s11 = int_to_ptr.vmem [resolvable:$true] %s4_s11 }
   0x3   :  { %p11_p0 = scmp.ne.s32.totalorder %s2_s8, %s34_s14  ;;  %p13_p1 = scmp.lt.u32.totalorder %s2_s8, %s59_s0 }
   0x4   :  { %p14_p2 = scmp.lt.u32.totalorder %s34_s14, %s34_s14  ;;  %p16_p4 = scmp.lt.u32.totalorder %s34_s14, %s2_s8 }
   0x6   :  { %p15_p3 = por %p14_p2, %p13_p1 }
   0x8   :  { %p17_p5 = por %p16_p4, %p15_p3 }
   0xa   :  { %p18_p6 = pnand %p17_p5, %p11_p0 }
   0xc   :  { %21 = shalt.err (!%p18_p6)  }
   0xd   :  { %s22_s17 = scalar_lea.vmem %s5_s11, 128  ;;  %p27_p8 = scmp.lt.s32.totalorder %s5_s11, %s5_s11 }
   0xe   :  { %p23_p7 = scmp.ne.s32.totalorder %s5_s11, %s22_s17  ;;  %p28_p9 = scmp.lt.s32.totalorder %s22_s17, %s22_s17 }
  0x10   :  { %p29_p10 = por %p28_p9, %p27_p8 }
  0x12   :  { %p30_p11 = pnand %p29_p10, %p23_p7 }
  0x14   :  { %33 = shalt.err (!%p30_p11)  }
  0x15   :  { %7 = dma.hbm_to_vmem [thread:$0]  %s2_s8, 128, %s5_s11, [#allocation0] }
  0x16   :  { %35 = dma.done.wait [#allocation0], 128  }
  0x17   :  { %36 = vsyncadd [#allocation0], 4294967168 }
  0x18   :  { %9 = vsyncpa [#allocation0], 1 }

// kernel: flexible_pinn_forward.1
= control target key start
LH: loop header
LB: loop body
LE: loop exit
PB: predicated region body
PF: predicated region fallthrough
CT: control target
= control target key end

     0   :  { %v611_v2 = vmov 0.0   ;;  %vm38_vm0 = vcmask 64512   ;;  %s982_s3 = inlined_call_operand.vmem [shape: f32[8,256], index: 3, kind: input, shape index: {}]   ;;  %s983_s1 = inlined_call_operand.vmem [shape: f32[8,8], index: 1, kind: input, shape index: {}]   ;;  %s984_s2 = inlined_call_operand.vmem [shape: f32[8,256], index: 2, kind: input, shape index: {}]   ;;  %s985_s5 = inlined_call_operand.vmem [shape: f32[256,256], index: 5, kind: input, shape index: {}]   ;;  %s986_s0 = inlined_call_operand.vmem [shape: f32[8,8], index: 0, kind: input, shape index: {}]   ;;  %s987_s7 = inlined_call_operand.vmem [shape: f32[256,128], index: 7, kind: input, shape index: {}]   ;;  %s988_s4 = inlined_call_operand.vmem [shape: f32[1,256], index: 4, kind: input, shape index: {}]   ;;  %s989_s6 = inlined_call_operand.vmem [shape: f32[1,256], index: 6, kind: input, shape index: {}]   ;;  %s990_s8 = inlined_call_operand.vmem [shape: f32[1,128], index: 8, kind: input, shape index: {}]   ;;  %s991_s9 = inlined_call_operand.vmem [shape: f32[8,128], index: 9, kind: output, shape index: {}]  }
   0x1   :  { %v37_v0 = vld [vmem:[%s982_s3 + $0x8] sm:$0xff]  ;;  %v36_v1 = vld [vmem:[%s982_s3] sm:$0xff]  ;;  %106 = vmatprep.mubr.f32.mxu0 %v611_v2  ;;  %v206_v7 = vld [vmem:[%s985_s5 + $0x18] sm:$0xff] }
   0x2   :  { %v35_v3 = vld [vmem:[%s983_s1] sm:$0xff]  ;;  %42 = vmatprep.subr.mxu0 %v37_v0  ;;  %v34_v4 = vld [vmem:[%s984_s2 + $0x8] sm:$0xff]  ;;  %v205_v10 = vld [vmem:[%s985_s5 + $0x10] sm:$0xff] }
   0x3   :  { %v33_v5 = vld [vmem:[%s984_s2] sm:$0xff]  ;;  %43 = vmatpush1.msra.mxu0 %v36_v1  ;;  %v204_v6 = vld [vmem:[%s985_s5 + $0x8] sm:$0xff]  ;;  %v210_v12 = vld [vmem:[%s985_s5 + $0x38] sm:$0xff] }
   0x4   :  { %v203_v8 = vld [vmem:[%s985_s5] sm:$0xff]  ;;  %466 = vmatmul.mubr.msk.f32.vlgmr.msra.gmra.mrb[0].mxu0 %vm38_vm0, %v35_v3  ;;  %116 = vmatprep.subr.mxu0 %v34_v4  ;;  %v504_v9 = vpack.c.bf16 %v206_v7, %v204_v6  ;;  %v208_v11 = vld [vmem:[%s985_s5 + $0x28] sm:$0xff]  ;;  %v209_v16 = vld [vmem:[%s985_s5 + $0x30] sm:$0xff] }
   0x5   :  { %117 = vmatpush1.msra.mxu0 %v33_v5  ;;  %180 = vmatprep.mubr.f32.mxu0 %v611_v2  ;;  %v506_v13 = vpack.c.bf16 %v205_v10, %v203_v8  ;;  %v508_v14 = vpack.c.bf16 %v210_v12, %v208_v11  ;;  %v207_v15 = vld [vmem:[%s985_s5 + $0x20] sm:$0xff]  ;;  %v212_v17 = vld [vmem:[%s985_s5 + $0x48] sm:$0xff]  ;;  %v214_v18 = vld [vmem:[%s985_s5 + $0x58] sm:$0xff] }
   0x6   :  { %505 = vmatprep.subr.bf16.mxu1 %v504_v9  ;;  %v510_v19 = vpack.c.bf16 %v209_v16, %v207_v15  ;;  %v512_v20 = vpack.c.bf16 %v214_v18, %v212_v17  ;;  %v211_v21 = vld [vmem:[%s985_s5 + $0x40] sm:$0xff]  ;;  %v213_v22 = vld [vmem:[%s985_s5 + $0x50] sm:$0xff]  ;;  %v216_v24 = vld [vmem:[%s985_s5 + $0x68] sm:$0xff] }
   0x7   :  { %507 = vmatpush1.bf16.msra.mxu1 %v506_v13  ;;  %v32_v23 = vld [vmem:[%s986_s0] sm:$0xff]  ;;  %v218_v25 = vld [vmem:[%s985_s5 + $0x78] sm:$0xff]  ;;  %v514_v26 = vpack.c.bf16 %v213_v22, %v211_v21  ;;  %v217_v29 = vld [vmem:[%s985_s5 + $0x70] sm:$0xff] }
   0x8   :  { %509 = vmatprep.subr.bf16.mxu1 %v508_v14  ;;  %v516_v27 = vpack.c.bf16 %v218_v25, %v216_v24  ;;  %v215_v28 = vld [vmem:[%s985_s5 + $0x60] sm:$0xff]  ;;  %v220_v30 = vld [vmem:[%s985_s5 + $0x88] sm:$0xff]  ;;  %v222_v31 = vld [vmem:[%s985_s5 + $0x98] sm:$0xff] }
   0x9   :  { %v518_v32 = vpack.c.bf16 %v217_v29, %v215_v28  ;;  %v520_v33 = vpack.c.bf16 %v222_v31, %v220_v30  ;;  %v219_v34 = vld [vmem:[%s985_s5 + $0x80] sm:$0xff]  ;;  %v221_v35 = vld [vmem:[%s985_s5 + $0x90] sm:$0xff]  ;;  %v224_v36 = vld [vmem:[%s985_s5 + $0xa8] sm:$0xff] }
   0xa   :  { %v226_v37 = vld [vmem:[%s985_s5 + $0xb8] sm:$0xff]  ;;  %v522_v38 = vpack.c.bf16 %v221_v35, %v219_v34  ;;  %v223_v40 = vld [vmem:[%s985_s5 + $0xa0] sm:$0xff]  ;;  %v225_v41 = vld [vmem:[%s985_s5 + $0xb0] sm:$0xff] }
   0xb   :  { %511 = vmatpush1.bf16.msra.mxu1 %v510_v19  ;;  %v524_v39 = vpack.c.bf16 %v226_v37, %v224_v36  ;;  %v228_v42 = vld [vmem:[%s985_s5 + $0xc8] sm:$0xff]  ;;  %v230_v43 = vld [vmem:[%s985_s5 + $0xd8] sm:$0xff]  ;;  %v526_v44 = vpack.c.bf16 %v225_v41, %v223_v40  ;;  %v227_v46 = vld [vmem:[%s985_s5 + $0xc0] sm:$0xff] }
   0xc   :  { %467 = vmatmul.mubr.msk.f32.vlgmr.msra.gmra.mrb[0].mxu0 %vm38_vm0, %v32_v23  ;;  %513 = vmatprep.subr.bf16.mxu1 %v512_v20  ;;  %v528_v45 = vpack.c.bf16 %v230_v43, %v228_v42  ;;  %v229_v47 = vld [vmem:[%s985_s5 + $0xd0] sm:$0xff]  ;;  %v232_v48 = vld [vmem:[%s985_s5 + $0xe8] sm:$0xff]  ;;  %v234_v49 = vld [vmem:[%s985_s5 + $0xf8] sm:$0xff] }
   0xd   :  { %v530_v50 = vpack.c.bf16 %v229_v47, %v227_v46  ;;  %v532_v51 = vpack.c.bf16 %v234_v49, %v232_v48  ;;  %v231_v52 = vld [vmem:[%s985_s5 + $0xe0] sm:$0xff]  ;;  %v233_v53 = vld [vmem:[%s985_s5 + $0xf0] sm:$0xff]  ;;  %v236_v54 = vld [vmem:[%s985_s5 + $0x108] sm:$0xff] }
   0xe   :  { %v238_v55 = vld [vmem:[%s985_s5 + $0x118] sm:$0xff]  ;;  %v534_v56 = vpack.c.bf16 %v233_v53, %v231_v52  ;;  %v235_v58 = vld [vmem:[%s985_s5 + $0x100] sm:$0xff]  ;;  %v237_v59 = vld [vmem:[%s985_s5 + $0x110] sm:$0xff] }
   0xf   :  { %515 = vmatpush1.bf16.msra.mxu1 %v514_v26  ;;  %v536_v57 = vpack.c.bf16 %v238_v55, %v236_v54  ;;  %v240_v60 = vld [vmem:[%s985_s5 + $0x128] sm:$0xff]  ;;  %v242_v61 = vld [vmem:[%s985_s5 + $0x138] sm:$0xff]  ;;  %v538_v62 = vpack.c.bf16 %v237_v59, %v235_v58  ;;  %v239_v0 = vld [vmem:[%s985_s5 + $0x120] sm:$0xff] }
  0x10   :  { %517 = vmatprep.subr.bf16.mxu1 %v516_v27  ;;  %v540_v63 = vpack.c.bf16 %v242_v61, %v240_v60  ;;  %v241_v1 = vld [vmem:[%s985_s5 + $0x130] sm:$0xff]  ;;  %v244_v2 = vld [vmem:[%s985_s5 + $0x148] sm:$0xff]  ;;  %v246_v3 = vld [vmem:[%s985_s5 + $0x158] sm:$0xff] }
  0x11   :  { %v542_v4 = vpack.c.bf16 %v241_v1, %v239_v0  ;;  %v544_v5 = vpack.c.bf16 %v246_v3, %v244_v2  ;;  %v243_v6 = vld [vmem:[%s985_s5 + $0x140] sm:$0xff]  ;;  %v245_v7 = vld [vmem:[%s985_s5 + $0x150] sm:$0xff]  ;;  %v248_v8 = vld [vmem:[%s985_s5 + $0x168] sm:$0xff] }
  0x12   :  { %v250_v9 = vld [vmem:[%s985_s5 + $0x178] sm:$0xff]  ;;  %v546_v10 = vpack.c.bf16 %v245_v7, %v243_v6  ;;  %v247_v12 = vld [vmem:[%s985_s5 + $0x160] sm:$0xff]  ;;  %v249_v13 = vld [vmem:[%s985_s5 + $0x170] sm:$0xff] }
  0x13   :  { %519 = vmatpush1.bf16.msra.mxu1 %v518_v32  ;;  %v548_v11 = vpack.c.bf16 %v250_v9, %v248_v8  ;;  %v550_v14 = vpack.c.bf16 %v249_v13, %v247_v12  ;;  %v252_v15 = vld [vmem:[%s985_s5 + $0x188] sm:$0xff]  ;;  %v254_v16 = vld [vmem:[%s985_s5 + $0x198] sm:$0xff]  ;;  %v251_v18 = vld [vmem:[%s985_s5 + $0x180] sm:$0xff] }
  0x14   :  { %521 = vmatprep.subr.bf16.mxu1 %v520_v33  ;;  %v552_v17 = vpack.c.bf16 %v254_v16, %v252_v15  ;;  %v253_v19 = vld [vmem:[%s985_s5 + $0x190] sm:$0xff]  ;;  %v256_v21 = vld [vmem:[%s985_s5 + $0x1a8] sm:$0xff]  ;;  %v258_v22 = vld [vmem:[%s985_s5 + $0x1b8] sm:$0xff] }
  0x15   :  { %v554_v20 = vpack.c.bf16 %v253_v19, %v251_v18  ;;  %v556_v23 = vpack.c.bf16 %v258_v22, %v256_v21  ;;  %v255_v24 = vld [vmem:[%s985_s5 + $0x1a0] sm:$0xff]  ;;  %v257_v25 = vld [vmem:[%s985_s5 + $0x1b0] sm:$0xff]  ;;  %v260_v27 = vld [vmem:[%s985_s5 + $0x1c8] sm:$0xff] }
  0x16   :  { %v558_v26 = vpack.c.bf16 %v257_v25, %v255_v24  ;;  %v262_v28 = vld [vmem:[%s985_s5 + $0x1d8] sm:$0xff]  ;;  %v259_v29 = vld [vmem:[%s985_s5 + $0x1c0] sm:$0xff]  ;;  %v261_v31 = vld [vmem:[%s985_s5 + $0x1d0] sm:$0xff] }
  0x17   :  { %523 = vmatpush1.bf16.msra.mxu1 %v522_v38  ;;  %v560_v30 = vpack.c.bf16 %v262_v28, %v260_v27  ;;  %v264_v32 = vld [vmem:[%s985_s5 + $0x1e8] sm:$0xff]  ;;  %v266_v33 = vld [vmem:[%s985_s5 + $0x1f8] sm:$0xff]  ;;  %v562_v34 = vpack.c.bf16 %v261_v31, %v259_v29  ;;  %v263_v36 = vld [vmem:[%s985_s5 + $0x1e0] sm:$0xff] }
  0x18   :  { %525 = vmatprep.subr.bf16.mxu1 %v524_v39  ;;  %v564_v35 = vpack.c.bf16 %v266_v33, %v264_v32  ;;  %v265_v37 = vld [vmem:[%s985_s5 + $0x1f0] sm:$0xff]  ;;  %v368_v39 = vld [vmem:[%s987_s7 + $0x80] sm:$0xff]  ;;  %v369_v40 = vld [vmem:[%s987_s7 + $0x88] sm:$0xff] }
  0x19   :  { %v566_v38 = vpack.c.bf16 %v265_v37, %v263_v36  ;;  %v352_v41 = vld [vmem:[%s987_s7] sm:$0xff]  ;;  %v568_v42 = vpack.c.bf16 %v369_v40, %v368_v39  ;;  %v353_v43 = vld [vmem:[%s987_s7 + $0x8] sm:$0xff]  ;;  %v354_v48 = vld [vmem:[%s987_s7 + $0x10] sm:$0xff] }
  0x1a   :  { %v570_v46 = vpack.c.bf16 %v353_v43, %v352_v41  ;;  %v355_v49 = vld [vmem:[%s987_s7 + $0x18] sm:$0xff]  ;;  %v356_v54 = vld [vmem:[%s987_s7 + $0x20] sm:$0xff]  ;;  %v357_v55 = vld [vmem:[%s987_s7 + $0x28] sm:$0xff] }
  0x1b   :  { %527 = vmatpush1.bf16.msra.mxu1 %v526_v44  ;;  %v370_v44 = vld [vmem:[%s987_s7 + $0x90] sm:$0xff]  ;;  %569 = vmatprep.subr.bf16.mxu0 %v568_v42  ;;  %v574_v52 = vpack.c.bf16 %v355_v49, %v354_v48  ;;  %v578_v58 = vpack.c.bf16 %v357_v55, %v356_v54  ;;  %v359_v61 = vld [vmem:[%s987_s7 + $0x38] sm:$0xff]  ;;  %v187_v2 = vld [vmem:[%s988_s4] sm:$0x3] }
  0x1c   :  { %529 = vmatprep.subr.bf16.mxu1 %v528_v45  ;;  %v371_v45 = vld [vmem:[%s987_s7 + $0x98] sm:$0xff]  ;;  %571 = vmatpush3.bf16.msra.mxu0 %v570_v46  ;;  %v358_v60 = vld [vmem:[%s987_s7 + $0x30] sm:$0xff]  ;;  %v376_v12 = vld [vmem:[%s987_s7 + $0xc0] sm:$0xff] }
  0x1d   :  { %v572_v47 = vpack.c.bf16 %v371_v45, %v370_v44  ;;  %v377_v13 = vld [vmem:[%s987_s7 + $0xc8] sm:$0xff]  ;;  %v360_v15 = vld [vmem:[%s987_s7 + $0x40] sm:$0xff]  ;;  %v378_v18 = vld [vmem:[%s987_s7 + $0xd0] sm:$0xff] }
  0x1e   :  { %v361_v16 = vld [vmem:[%s987_s7 + $0x48] sm:$0xff]  ;;  %v379_v19 = vld [vmem:[%s987_s7 + $0xd8] sm:$0xff]  ;;  %v362_v21 = vld [vmem:[%s987_s7 + $0x50] sm:$0xff] }
  0x1f   :  { %531 = vmatpush1.bf16.msra.mxu1 %v530_v50  ;;  %v372_v50 = vld [vmem:[%s987_s7 + $0xa0] sm:$0xff]  ;;  %573 = vmatprep.subr.bf16.mxu0 %v572_v47  ;;  %v363_v22 = vld [vmem:[%s987_s7 + $0x58] sm:$0xff]  ;;  %v381_v25 = vld [vmem:[%s987_s7 + $0xe8] sm:$0xff] }
  0x20   :  { %533 = vmatprep.subr.bf16.mxu1 %v532_v51  ;;  %v373_v51 = vld [vmem:[%s987_s7 + $0xa8] sm:$0xff]  ;;  %575 = vmatpush3.bf16.msra.mxu0 %v574_v52  ;;  %v380_v24 = vld [vmem:[%s987_s7 + $0xe0] sm:$0xff]  ;;  %v382_v29 = vld [vmem:[%s987_s7 + $0xf0] sm:$0xff] }
  0x21   :  { %v576_v53 = vpack.c.bf16 %v373_v51, %v372_v50  ;;  %v592_v27 = vpack.c.bf16 %v381_v25, %v380_v24  ;;  %v365_v28 = vld [vmem:[%s987_s7 + $0x68] sm:$0xff]  ;;  %v366_v33 = vld [vmem:[%s987_s7 + $0x70] sm:$0xff]  ;;  %v267_v36 = vld [vmem:[%s989_s6] sm:$0x3] }
  0x22   :  { %v468_v46 = vld [vmem:[%s990_s8] ss:$0 sm:$0xff] }
  0x23   :  { %535 = vmatpush1.bf16.msra.mxu1 %v534_v56  ;;  %v374_v56 = vld [vmem:[%s987_s7 + $0xb0] sm:$0xff]  ;;  %577 = vmatprep.subr.bf16.mxu0 %v576_v53 }
  0x24   :  { %537 = vmatprep.subr.bf16.mxu1 %v536_v57  ;;  %v375_v57 = vld [vmem:[%s987_s7 + $0xb8] sm:$0xff]  ;;  %579 = vmatpush3.bf16.msra.mxu0 %v578_v58 }
  0x25   :  { %v580_v59 = vpack.c.bf16 %v375_v57, %v374_v56 }
  0x27   :  { %539 = vmatpush1.bf16.msra.mxu1 %v538_v62  ;;  %v582_v62 = vpack.c.bf16 %v359_v61, %v358_v60  ;;  %581 = vmatprep.subr.bf16.mxu0 %v580_v59 }
  0x28   :  { %541 = vmatprep.subr.bf16.mxu1 %v540_v63  ;;  %v189_v63 = vlaneseq }
  0x29   :  { %583 = vmatpush3.bf16.msra.mxu0 %v582_v62 }
  0x2a   :  { %v190_v0 = vshrl.u32 %v189_v63, 7 }
  0x2b   :  { %543 = vmatpush1.bf16.msra.mxu1 %v542_v4 }
  0x2c   :  { %545 = vmatprep.subr.bf16.mxu1 %v544_v5  ;;  %v191_v1 = vsub.s32 0, %v190_v0  ;;  %v195_v3 = vsub.s32 1, %v190_v0 }
  0x2e   :  { %v192_v4 = vrot.slane %v187_v2, %v191_v1  ;;  %v196_v5 = vrot.slane %v187_v2, %v195_v3  ;;  %v272_v37 = vrot.slane %v267_v36, %v191_v1 }
  0x2f   :  { %547 = vmatpush1.bf16.msra.mxu1 %v546_v10 }
  0x30   :  { %549 = vmatprep.subr.bf16.mxu1 %v548_v11 }
  0x33   :  { %551 = vmatpush1.bf16.msra.mxu1 %v550_v14  ;;  %v584_v14 = vpack.c.bf16 %v377_v13, %v376_v12 }
  0x34   :  { %553 = vmatprep.subr.bf16.mxu1 %v552_v17  ;;  %v586_v17 = vpack.c.bf16 %v361_v16, %v360_v15 }
  0x35   :  { %585 = vmatprep.subr.bf16.mxu0 %v584_v14 }
  0x36   :  { %587 = vmatpush3.bf16.msra.mxu0 %v586_v17 }
  0x37   :  { %555 = vmatpush1.bf16.msra.mxu1 %v554_v20  ;;  %v588_v20 = vpack.c.bf16 %v379_v19, %v378_v18 }
  0x38   :  { %557 = vmatprep.subr.bf16.mxu1 %v556_v23  ;;  %v590_v23 = vpack.c.bf16 %v363_v22, %v362_v21 }
  0x39   :  { %589 = vmatprep.subr.bf16.mxu0 %v588_v20 }
  0x3a   :  { %591 = vmatpush3.bf16.msra.mxu0 %v590_v23 }
  0x3b   :  { %559 = vmatpush1.bf16.msra.mxu1 %v558_v26  ;;  %v364_v26 = vld [vmem:[%s987_s7 + $0x60] sm:$0xff]  ;;  %593 = vmatprep.subr.bf16.mxu0 %v592_v27 }
  0x3c   :  { %561 = vmatprep.subr.bf16.mxu1 %v560_v30  ;;  %v383_v30 = vld [vmem:[%s987_s7 + $0xf8] sm:$0xff]  ;;  %v594_v31 = vpack.c.bf16 %v365_v28, %v364_v26 }
  0x3d   :  { %v596_v32 = vpack.c.bf16 %v383_v30, %v382_v29 }
  0x3e   :  { %595 = vmatpush3.bf16.msra.mxu0 %v594_v31 }
  0x3f   :  { %563 = vmatpush1.bf16.msra.mxu1 %v562_v34  ;;  %v367_v34 = vld [vmem:[%s987_s7 + $0x78] sm:$0xff]  ;;  %597 = vmatprep.subr.bf16.mxu0 %v596_v32 }
  0x40   :  { %565 = vmatprep.subr.bf16.mxu1 %v564_v35  ;;  %v598_v35 = vpack.c.bf16 %v367_v34, %v366_v33 }
  0x42   :  { %599 = vmatpush3.bf16.msra.mxu0 %v598_v35 }
  0x43   :  { %567 = vmatpush1.bf16.msra.mxu1 %v566_v38  ;;  %v276_v38 = vrot.slane %v267_v36, %v195_v3 }
  0xdf   :  { %v182_v6 = vpop.f32.mrb[0].mxu0 }
  0xe0   :  { %v199_v7 = vadd.f32 %v192_v4, %v182_v6  ;;  %v184_v8 = vpop.f32.mrb[1].mxu0 }
  0xe1   :  { %v200_v9 = vadd.f32 %v196_v5, %v184_v8 }
  0xe3   :  { %603 = vtanh.f32 %v200_v9 }
  0xe4   :  { %605 = vtanh.f32 %v199_v7 }
  0xed   :  { %v604_v10 = vpop.eup %603 }
  0xee   :  { %v606_v11 = vpop.eup %605  ;;  %343 = vmatprep.mubr.f32.mxu1 %v604_v10 }
  0xef   :  { %344 = vmatmul.mubr.f32.vlgmr.msra.gmra.mrb[0].mxu1 %v606_v11 }
 0x1c2   :  { %v345_v39 = vpop.f32.mrb[0].mxu1 }
 0x1c3   :  { %v346_v40 = vadd.f32 %v345_v39, %v272_v37  ;;  %v347_v41 = vpop.f32.mrb[1].mxu1 }
 0x1c4   :  { %v348_v42 = vadd.f32 %v347_v41, %v276_v38 }
 0x1c6   :  { %607 = vtanh.f32 %v348_v42 }
 0x1c7   :  { %609 = vtanh.f32 %v346_v40 }
 0x1d0   :  { %v608_v43 = vpop.eup %607 }
 0x1d1   :  { %v610_v44 = vpop.eup %609  ;;  %455 = vmatprep.mubr.f32.mxu0 %v608_v43 }
 0x1d2   :  { %456 = vmatmul.mubr.f32.vlgmr.msra.gmra.mrb[2].mxu0 %v610_v44 }
 0x2a5   :  { %v501_v45 = vpop.f32.mrb[2].mxu0 }
 0x2a6   :  { %v502_v47 = vpop.f32.mrb[3].mxu0 }
 0x2a7   :  { %v503_v48 = vadd.f32 %v502_v47, %v501_v45 }
 0x2a9   :  { %v458_v49 = vadd.f32 %v503_v48, %v468_v46 }
 0x2ab   :  { %461 = vst [vmem:[%s991_s9] sm:$0xff] %v458_v49 }

</bundles_post_ra>
